<compile_context>
chip_gen: v6e
topology: v6e:2x2x1
jax: 0.10.0
libtpu: 0.0.40
codegen_flags: <defaults>
</compile_context>

<pallas_src>
import functools
import math

import jax
import jax.numpy as jnp
from jax import lax
from jax.experimental import pallas as pl
from jax.experimental.pallas import tpu as pltpu

# Modest scoped-VMEM budget valid on v5e/v6e/v7x (raise per generation: v5e's
# default is only 16 MiB; v7x physical VMEM is 64 MiB so keep headroom).
_VMEM_LIMIT = 32 * 1024 * 1024


def _fit_tile(dim, cap, align):
    """Largest tile <= cap that divides `dim` and is a multiple of `align`.

    Falls back to the full dimension (single block) if no aligned divisor
    exists — a full-extent block always satisfies the TPU (8,128) rule."""
    if dim <= cap:
        return dim
    t = (cap // align) * align
    while t >= align:
        if dim % t == 0:
            return t
        t -= align
    return dim


# ----------------------------------------------------------------------------
# Kernel 1: tiled, pipelined matmul (q/k/v fused projection and o_proj)
# grid = (M//tm, N//tn, K//tk), fp32 accumulator scratch, K innermost.
# ----------------------------------------------------------------------------
def _matmul_kernel(a_ref, b_ref, o_ref, acc_ref):
    @pl.when(pl.program_id(2) == 0)
    def _init():
        acc_ref[...] = jnp.zeros(acc_ref.shape, jnp.float32)

    acc_ref[...] += jnp.dot(
        a_ref[...], b_ref[...], preferred_element_type=jnp.float32
    )

    @pl.when(pl.program_id(2) == pl.num_programs(2) - 1)
    def _finalize():
        o_ref[...] = acc_ref[...].astype(o_ref.dtype)


def pallas_matmul(a, b, *, block_m=256, block_n=256, block_k=512):
    """a: (M, K) @ b: (K, N) -> (M, N), MXU matmul with fp32 accumulation."""
    M, K = a.shape
    K2, N = b.shape
    assert K == K2
    tm = _fit_tile(M, block_m, 8)
    tn = _fit_tile(N, block_n, 128)
    tk = _fit_tile(K, block_k, 128)
    grid = (M // tm, N // tn, K // tk)
    return pl.pallas_call(
        _matmul_kernel,
        out_shape=jax.ShapeDtypeStruct((M, N), a.dtype),
        grid=grid,
        in_specs=[
            pl.BlockSpec((tm, tk), lambda i, j, k: (i, k)),
            pl.BlockSpec((tk, tn), lambda i, j, k: (k, j)),
        ],
        out_specs=pl.BlockSpec((tm, tn), lambda i, j, k: (i, j)),
        scratch_shapes=[pltpu.VMEM((tm, tn), jnp.float32)],
        compiler_params=pltpu.CompilerParams(
            dimension_semantics=("parallel", "parallel", "arbitrary"),
            vmem_limit_bytes=_VMEM_LIMIT,
        ),
    )(a, b)


# ----------------------------------------------------------------------------
# Kernel 2: RoPE + flash attention (online softmax, KV-tiled)
# grid = (B, H, S//tq, S//tkv); KV axis innermost ("arbitrary").
# ----------------------------------------------------------------------------
def _rotate_half(x):
    """rotate_half on the last axis of a 2-D fp32 tile."""
    d = x.shape[-1]
    half = d // 2
    if d % 128 == 0:
        # Lane rotation on the XLU (free slot alongside VPU work) + sign mult.
        col = lax.broadcasted_iota(jnp.int32, x.shape, x.ndim - 1)
        sign = jnp.where(col < half, -1.0, 1.0)
        return pltpu.roll(x, shift=half, axis=-1) * sign
    # Small / unaligned head_dim: fall back to negated-halves concatenate.
    return jnp.concatenate([-x[:, half:], x[:, :half]], axis=-1)


def _flash_attn_kernel(q_ref, k_ref, v_ref, cq_ref, sq_ref, ck_ref, sk_ref,
                       mask_ref, o_ref, qrot_sc, m_sc, l_sc, acc_sc, *, sm_scale):
    j = pl.program_id(3)
    n_kv = pl.num_programs(3)

    @pl.when(j == 0)
    def _init():
        m_sc[...] = jnp.full(m_sc.shape, -jnp.inf, jnp.float32)
        l_sc[...] = jnp.zeros(l_sc.shape, jnp.float32)
        acc_sc[...] = jnp.zeros(acc_sc.shape, jnp.float32)
        # RoPE on the q tile once per (b, h, q-block); reused across kv steps.
        qf = q_ref[0, 0].astype(jnp.float32)
        cq = cq_ref[0].astype(jnp.float32)
        sq = sq_ref[0].astype(jnp.float32)
        qrot_sc[...] = (qf * cq + _rotate_half(qf) * sq).astype(qrot_sc.dtype)

    # RoPE on the streamed k tile (required per kv block).
    kf = k_ref[0, 0].astype(jnp.float32)
    ck = ck_ref[0].astype(jnp.float32)
    sk = sk_ref[0].astype(jnp.float32)
    k_rot = (kf * ck + _rotate_half(kf) * sk).astype(k_ref.dtype)

    # scores = (q . k^T) / sqrt(D) — contract last axes, no explicit transpose.
    s = lax.dot_general(
        qrot_sc[...], k_rot,
        dimension_numbers=(((1,), (1,)), ((), ())),
        preferred_element_type=jnp.float32,
    )
    s = s * sm_scale
    s = s + mask_ref[0, 0].astype(jnp.float32)
    s = jnp.maximum(s, jnp.finfo(jnp.float32).min)

    # Online softmax update (fp32).
    m_prev = m_sc[...]
    m_new = jnp.maximum(m_prev, jnp.max(s, axis=-1, keepdims=True))
    alpha = jnp.exp(m_prev - m_new)
    p = jnp.exp(s - m_new)
    l_sc[...] = alpha * l_sc[...] + jnp.sum(p, axis=-1, keepdims=True)
    acc_sc[...] = alpha * acc_sc[...] + jnp.dot(
        p.astype(v_ref.dtype), v_ref[0, 0], preferred_element_type=jnp.float32
    )
    m_sc[...] = m_new

    @pl.when(j == n_kv - 1)
    def _finalize():
        l = l_sc[...]
        inv = pl.reciprocal(l, approx=True)
        inv = inv * (2.0 - l * inv)  # one Newton step -> ~fp32-exact
        o_ref[0, 0] = (acc_sc[...] * inv).astype(o_ref.dtype)


def pallas_flash_attention(q, k, v, cos_g, sin_g, mask, *, block_q=256, block_kv=256):
    """q,k,v: (B,H,S,D); cos_g,sin_g: (B,S,D); mask: (B,1,S,S) additive."""
    B, H, S, D = q.shape
    tq = _fit_tile(S, block_q, 8)
    tkv = _fit_tile(S, block_kv, 128)  # also the mask block's lane dim
    grid = (B, H, S // tq, S // tkv)

    kernel = functools.partial(_flash_attn_kernel, sm_scale=1.0 / math.sqrt(D))

    return pl.pallas_call(
        kernel,
        out_shape=jax.ShapeDtypeStruct((B, H, S, D), q.dtype),
        grid=grid,
        in_specs=[
            pl.BlockSpec((1, 1, tq, D), lambda b, h, i, j: (b, h, i, 0)),   # q
            pl.BlockSpec((1, 1, tkv, D), lambda b, h, i, j: (b, h, j, 0)),  # k
            pl.BlockSpec((1, 1, tkv, D), lambda b, h, i, j: (b, h, j, 0)),  # v
            pl.BlockSpec((1, tq, D), lambda b, h, i, j: (b, i, 0)),         # cos(q)
            pl.BlockSpec((1, tq, D), lambda b, h, i, j: (b, i, 0)),         # sin(q)
            pl.BlockSpec((1, tkv, D), lambda b, h, i, j: (b, j, 0)),        # cos(k)
            pl.BlockSpec((1, tkv, D), lambda b, h, i, j: (b, j, 0)),        # sin(k)
            pl.BlockSpec((1, 1, tq, tkv), lambda b, h, i, j: (b, 0, i, j)), # mask
        ],
        out_specs=pl.BlockSpec((1, 1, tq, D), lambda b, h, i, j: (b, h, i, 0)),
        scratch_shapes=[
            pltpu.VMEM((tq, D), q.dtype),      # rotated q (cached across kv steps)
            pltpu.VMEM((tq, 1), jnp.float32),  # running max
            pltpu.VMEM((tq, 1), jnp.float32),  # running sum
            pltpu.VMEM((tq, D), jnp.float32),  # fp32 output accumulator
        ],
        compiler_params=pltpu.CompilerParams(
            dimension_semantics=("parallel", "parallel", "parallel", "arbitrary"),
            vmem_limit_bytes=_VMEM_LIMIT,
        ),
    )(q, k, v, cos_g, sin_g, cos_g, sin_g, mask)


# ----------------------------------------------------------------------------
# LlamaAttention module in JAX, compute delegated to the Pallas kernels above
# ----------------------------------------------------------------------------
class LlamaAttentionPallas:
    def __init__(self, hidden_size, r_model, num_heads,
                 max_position_embeddings=2048, base=10000.0, key=None,
                 attn_block_q=256, attn_block_kv=256):
        self.hidden_size = hidden_size
        self.r_model = r_model
        self.num_heads = num_heads
        self.head_dim = hidden_size // num_heads
        assert self.head_dim * num_heads == hidden_size
        self.max_position_embeddings = max_position_embeddings
        self.attn_block_q = attn_block_q
        self.attn_block_kv = attn_block_kv

        k1, k2, k3, k4 = jax.random.split(key, 4)
        scale = 0.1
        # PyTorch nn.Linear weight layout is (out_features, in_features).
        self.wq = scale * jax.random.normal(k1, (hidden_size, r_model), jnp.float32)
        self.wk = scale * jax.random.normal(k2, (hidden_size, r_model), jnp.float32)
        self.wv = scale * jax.random.normal(k3, (hidden_size, r_model), jnp.float32)
        self.wo = scale * jax.random.normal(k4, (r_model, hidden_size), jnp.float32)

        # Pre-transposed / fused weights built ONCE (no per-call .T transposes,
        # single pipelined QKV matmul instead of three).
        self.w_qkv = jnp.concatenate([self.wq.T, self.wk.T, self.wv.T], axis=1)
        self.w_o = self.wo.T                                   # (hidden, r_model)

        # LlamaRotaryEmbedding caches, stored as (max_pos, head_dim).
        inv_freq = 1.0 / (base ** (jnp.arange(0, self.head_dim, 2, dtype=jnp.float32)
                                   / self.head_dim))
        t = jnp.arange(max_position_embeddings, dtype=jnp.float32)
        freqs = jnp.einsum("i,j->ij", t, inv_freq)
        emb = jnp.concatenate([freqs, freqs], axis=-1)
        self.cos_cached = jnp.cos(emb)
        self.sin_cached = jnp.sin(emb)

    def __call__(self, hidden_states, attention_mask, position_ids):
        bsz, q_len, _ = hidden_states.shape
        H, D = self.num_heads, self.head_dim

        x2d = hidden_states.reshape(bsz * q_len, self.r_model)

        # Fused QKV projection: one tiled, pipelined pass over the activations.
        qkv = pallas_matmul(x2d, self.w_qkv)                   # (B*S, 3*hidden)
        qkv = qkv.reshape(bsz, q_len, 3, H, D)
        q = qkv[:, :, 0].transpose(0, 2, 1, 3)                 # (B, H, S, D)
        k = qkv[:, :, 1].transpose(0, 2, 1, 3)
        v = qkv[:, :, 2].transpose(0, 2, 1, 3)

        # Gather rotary tables at position_ids: (B, S, D).
        cos_g = self.cos_cached[position_ids].astype(hidden_states.dtype)
        sin_g = self.sin_cached[position_ids].astype(hidden_states.dtype)

        # RoPE + flash attention (online softmax, KV-tiled) in Pallas.
        attn = pallas_flash_attention(
            q, k, v, cos_g, sin_g, attention_mask,
            block_q=self.attn_block_q, block_kv=self.attn_block_kv)

        # (B, H, S, D) -> (B*S, hidden), then output projection.
        attn = attn.transpose(0, 2, 1, 3).reshape(bsz * q_len, self.hidden_size)
        out = pallas_matmul(attn, self.w_o)
        return out.reshape(bsz, q_len, self.r_model)


# ----------------------------------------------------------------------------
# Pure-JAX reference (mirrors the PyTorch forward exactly) for validation
# ----------------------------------------------------------------------------
def reference_forward(mod, hidden_states, attention_mask, position_ids):
    bsz, q_len, _ = hidden_states.shape
    H, D = mod.num_heads, mod.head_dim
    q = (hidden_states @ mod.wq.T).reshape(bsz, q_len, H, D).transpose(0, 2, 1, 3)
    k = (hidden_states @ mod.wk.T).reshape(bsz, q_len, H, D).transpose(0, 2, 1, 3)
    v = (hidden_states @ mod.wv.T).reshape(bsz, q_len, H, D).transpose(0, 2, 1, 3)

    cos = mod.cos_cached[position_ids][:, None, :, :]   # (B,1,S,D)
    sin = mod.sin_cached[position_ids][:, None, :, :]

    def rot_half(x):
        half = x.shape[-1] // 2
        return jnp.concatenate([-x[..., half:], x[..., :half]], axis=-1)

    q = q * cos + rot_half(q) * sin
    k = k * cos + rot_half(k) * sin

    scores = jnp.einsum("bhqd,bhkd->bhqk", q, k) / math.sqrt(D)
    scores = scores + attention_mask
    scores = jnp.maximum(scores, jnp.finfo(jnp.float32).min)
    p = jax.nn.softmax(scores.astype(jnp.float32), axis=-1).astype(q.dtype)
    attn = jnp.einsum("bhqk,bhkd->bhqd", p, v)
    attn = attn.transpose(0, 2, 1, 3).reshape(bsz, q_len, mod.hidden_size)
    return attn @ mod.wo.T


if __name__ == "__main__":
    key = jax.random.PRNGKey(0)
    k_param, k_x, k_a, k_b = jax.random.split(key, 4)

    # Standalone check of the tiled matmul's K-reduction / accumulator path.
    a = jax.random.normal(k_a, (64, 256), jnp.float32)
    b = jax.random.normal(k_b, (256, 128), jnp.float32)
    got = pallas_matmul(a, b, block_m=32, block_n=128, block_k=128)
    want = jnp.dot(a, b, precision=lax.Precision.HIGHEST)
    assert jnp.allclose(got, want, atol=1e-3, rtol=1e-3), "matmul mismatch"

    # Module-level check. Small feature dims; q_len=256 with 128-wide attention
    # blocks so the flash (multi-KV-block) online-softmax path is exercised.
    bsz, q_len = 2, 256
    hidden_size = 32
    r_model = 32
    num_heads = 4

    mod = LlamaAttentionPallas(hidden_size, r_model, num_heads,
                               max_position_embeddings=512, key=k_param,
                               attn_block_q=128, attn_block_kv=128)

    hidden_states = jax.random.normal(k_x, (bsz, q_len, r_model), jnp.float32)
    position_ids = jnp.broadcast_to(jnp.arange(q_len, dtype=jnp.int32), (bsz, q_len))

    # Causal additive mask (HF style): 0 where allowed, finfo.min where masked.
    neg = jnp.finfo(jnp.float32).min
    causal = jnp.tril(jnp.ones((q_len, q_len), dtype=bool))
    attention_mask = jnp.where(causal, 0.0, neg)[None, None, :, :]
    attention_mask = jnp.broadcast_to(attention_mask, (bsz, 1, q_len, q_len))

    out = mod(hidden_states, attention_mask, position_ids)
    out = jax.block_until_ready(out)

    ref = reference_forward(mod, hidden_states, attention_mask, position_ids)
    assert out.shape == (bsz, q_len, r_model)
    assert jnp.allclose(out, ref, atol=2e-4, rtol=2e-4), "mismatch vs reference"

    print("KERNEL_OK")
</pallas_src>

<mosaic_0001>
module attributes {stable_mosaic.version = 11 : i64} {
  func.func @_matmul_kernel(%arg0: i32, %arg1: i32, %arg2: i32, %arg3: memref<32x128xf32, #tpu.memory_space<vmem>>, %arg4: memref<128x128xf32, #tpu.memory_space<vmem>>, %arg5: memref<32x128xf32, #tpu.memory_space<vmem>>, %arg6: memref<32x128xf32, #tpu.memory_space<vmem>>) attributes {dimension_semantics = [#tpu.dimension_semantics<parallel>, #tpu.dimension_semantics<parallel>, #tpu.dimension_semantics<arbitrary>], iteration_bounds = array<i64: 2, 1, 2>, scalar_prefetch = 0 : i64, scratch_operands = 1 : i64, tpu.core_type = #tpu.core_type<tc>, window_params = [{transform_indices = @transform_0, window_bounds = array<i64: 32, 128>}, {transform_indices = @transform_1, window_bounds = array<i64: 128, 128>}, {transform_indices = @transform_2, window_bounds = array<i64: 32, 128>}]} {
    %c0_i32 = arith.constant 0 : i32
    %0 = arith.cmpi eq, %arg2, %c0_i32 : i32
    %1 = arith.extui %0 : i1 to i32
    %c0_i32_0 = arith.constant 0 : i32
    %2 = arith.cmpi ne, %1, %c0_i32_0 : i32
    scf.if %2 {
      %cst_9 = arith.constant 0.000000e+00 : f32
      %12 = vector.broadcast %cst_9 : f32 to vector<32x128xf32>
      %c0_10 = arith.constant 0 : index
      %c0_11 = arith.constant 0 : index
      %13 = vector.load %arg6[%c0_10, %c0_11] : memref<32x128xf32, #tpu.memory_space<vmem>>, vector<32x128xf32>
      tpu.vector_store %arg6[%c0_10, %c0_11], %12 {strides = array<i32>} : memref<32x128xf32, #tpu.memory_space<vmem>>, vector<32x128xf32>,
    } else {
    }
    %c0 = arith.constant 0 : index
    %c0_1 = arith.constant 0 : index
    %3 = vector.load %arg6[%c0, %c0_1] : memref<32x128xf32, #tpu.memory_space<vmem>>, vector<32x128xf32>
    %c0_2 = arith.constant 0 : index
    %c0_3 = arith.constant 0 : index
    %4 = vector.load %arg3[%c0_2, %c0_3] : memref<32x128xf32, #tpu.memory_space<vmem>>, vector<32x128xf32>
    %c0_4 = arith.constant 0 : index
    %c0_5 = arith.constant 0 : index
    %5 = vector.load %arg4[%c0_4, %c0_5] : memref<128x128xf32, #tpu.memory_space<vmem>>, vector<128x128xf32>
    %cst = arith.constant dense<0.000000e+00> : vector<32x128xf32>
    %6 = tpu.matmul %4, %5, %cst {dimension_numbers = #tpu.dot_dimension_numbers<[1], [0], [0], [1], [0, 0, 1, 1], [], []>} : vector<32x128xf32>, vector<128x128xf32>, vector<32x128xf32> -> vector<32x128xf32>
    %7 = arith.addf %3, %6 : vector<32x128xf32>
    %c0_6 = arith.constant 0 : index
    %c0_7 = arith.constant 0 : index
    %8 = vector.load %arg6[%c0_6, %c0_7] : memref<32x128xf32, #tpu.memory_space<vmem>>, vector<32x128xf32>
    tpu.vector_store %arg6[%c0_6, %c0_7], %7 {strides = array<i32>} : memref<32x128xf32, #tpu.memory_space<vmem>>, vector<32x128xf32>,
    %c1_i32 = arith.constant 1 : i32
    %9 = arith.cmpi eq, %arg2, %c1_i32 : i32
    %10 = arith.extui %9 : i1 to i32
    %c0_i32_8 = arith.constant 0 : i32
    %11 = arith.cmpi ne, %10, %c0_i32_8 : i32
    scf.if %11 {
      %c0_9 = arith.constant 0 : index
      %c0_10 = arith.constant 0 : index
      %12 = vector.load %arg6[%c0_9, %c0_10] : memref<32x128xf32, #tpu.memory_space<vmem>>, vector<32x128xf32>
      %c0_11 = arith.constant 0 : index
      %c0_12 = arith.constant 0 : index
      %13 = vector.load %arg5[%c0_11, %c0_12] : memref<32x128xf32, #tpu.memory_space<vmem>>, vector<32x128xf32>
      tpu.vector_store %arg5[%c0_11, %c0_12], %12 {strides = array<i32>} : memref<32x128xf32, #tpu.memory_space<vmem>>, vector<32x128xf32>,
    } else {
    }
    return
  }
  func.func @transform_0(%arg0: i32, %arg1: i32, %arg2: i32) -> (i32, i32) {
    %c0_i32 = arith.constant 0 : i32
    return %arg0, %arg2 : i32, i32
  }
  func.func @transform_1(%arg0: i32, %arg1: i32, %arg2: i32) -> (i32, i32) {
    %c0_i32 = arith.constant 0 : i32
    return %arg2, %arg1 : i32, i32
  }
  func.func @transform_2(%arg0: i32, %arg1: i32, %arg2: i32) -> (i32, i32) {
    %c0_i32 = arith.constant 0 : i32
    return %arg0, %arg1 : i32, i32
  }
}

</mosaic_0001>

<bundles_post_ra>
// kernel: tpu_custom_call.1
= control target key start
LH: loop header
LB: loop body
LE: loop exit
PB: predicated region body
PF: predicated region fallthrough
CT: control target
= control target key end

     0   :  { %s1304_s0 = inlined_call_operand.hbm [shape: f32[64,256], index: 0, kind: input, shape index: {}]   ;;  %s1305_s1 = inlined_call_operand.hbm [shape: f32[256,128], index: 1, kind: input, shape index: {}]   ;;  %s1306_s2 = inlined_call_operand.hbm [shape: f32[64,128], index: 2, kind: output, shape index: {}]  }
   0x1   :  { %1313 = sst [smem:[#allocation17_spill]] %s1304_s0 }
   0x2   :  { %1314 = sst [smem:[#allocation18_spill]] %s1305_s1 }
   0x3   :  { %1315 = sst [smem:[#allocation19_spill]] %s1306_s2 }
   0x4   :  { %7 = vsyncpa [#allocation4], 0 }
   0x5   :  { %9 = vsyncpa [#allocation4 + $0x1], 0 }
   0x6   :  { %10 = vsyncpa [#allocation7], 0 }
   0x7   :  { %12 = vsyncpa [#allocation7 + $0x1], 0 }
   0x8   :  { %13 = vsyncpa [#allocation5], 0 }
   0x9   :  { %15 = vsyncpa [#allocation5 + $0x1], 0  ;;  %s983_s9 = smov 0   ;;  %s985_s10 = smov 0  }
   0xa   :  { %s987_s11 = smov 0   ;;  %s989_s12 = smov 0  }
   0xb   :  { %s991_s13 = smov 0   ;;  %s993_s14 = smov 0  }
   0xc   :  { %s995_s15 = smov 0   ;;  %s997_s16 = smov 0  }
   0xd   :  { %s999_s17 = smov 0   ;;  %s1001_s18 = smov 0  }
   0xe   :  { %s1003_s19 = smov 0   ;;  %s1005_s20 = smov 0  }
   0xf   :  { %s1007_s21 = smov 0   ;;  %s1009_s22 = smov 0  }
  0x10 LB: > { %1316 = sst [smem:[#allocation12_spill]] %s905_s9  ;;  %s33_s23 = sadd.s32 1, %s949_s20  ;;  %s957_s22 = sphi %s1009_s22, %s21_s22   ;;  %s953_s21 = sphi %s1007_s21, %s1356_s21   ;;  %s949_s20 = sphi %s1005_s20, %s1355_s20   ;;  %s945_s19 = sphi %s1003_s19, %s1354_s19   ;;  %s941_s18 = sphi %s1001_s18, %s1353_s18   ;;  %s937_s17 = sphi %s999_s17, %s1352_s17   ;;  %s933_s16 = sphi %s997_s16, %s1351_s16   ;;  %s929_s15 = sphi %s995_s15, %s1350_s15   ;;  %s925_s14 = sphi %s993_s14, %s1349_s14   ;;  %s921_s13 = sphi %s991_s13, %s1348_s13   ;;  %s917_s12 = sphi %s989_s12, %s1347_s12   ;;  %s913_s11 = sphi %s987_s11, %s1346_s11   ;;  %s909_s10 = sphi %s985_s10, %s1345_s10   ;;  %s905_s9 = sphi %s983_s9, %s1344_s9  }
  0x11   : > { %1317 = sst [smem:[#allocation13_spill]] %s941_s18  ;;  %s40_s24 = sadd.s32 1, %s953_s21 }
  0x12   : > { %1318 = sst [smem:[#allocation14_spill]] %s945_s19  ;;  %p34_p0 = scmp.ge.s32.totalorder %s33_s23, 2 }
  0x13   : > { %s49_s25 = sadd.s32 1, %s937_s17  ;;  %p56_p1 = scmp.ne.s32.totalorder %s937_s17, %s933_s16 }
  0x14   : > { %p57_p2 = scmp.eq.s32.totalorder %s957_s22, 0  ;;  %s1358_s23 = smov (%p34_p0, %s33_s23), 0 }
  0x15   : > { %1319 = sst [smem:[#allocation15_spill]] %s1358_s23  ;;  %s1360_s24 = smov (!%p34_p0, %s40_s24), %s953_s21 }
  0x16   : > { %s1064_s26 = ssub.s32 %s949_s20, %s1358_s23  ;;  %p1068_p3 = por %p57_p2, %p56_p1 }
  0x17   : > { %p42_p4 = scmp.ge.s32.totalorder %s1360_s24, 2  ;;  %p62_p5 = scmp.ne.s32.totalorder %s933_s16, %s929_s15 }
  0x18   : > { %p75_p6 = scmp.eq.s32.totalorder %s1064_s26, 0  ;;  %s105_s28 = sadd.s32 1, %s913_s11 }
  0x19   : > { %s1362_s24 = smov (%p42_p4, %s1360_s24), 0  ;;  %p1309_p7 = scmp.lt.s32.totalorder %s957_s22, 4 }
  0x1a   : > { %1321 = sst [smem:[#allocation16_spill]] %s1362_s24  ;;  %s44_s29 = ssub.s32 %s953_s21, %s1362_s24 }
  0x1b   : > { %s142_s30 = sand.u32 1, %s937_s17   ;;  %s46_s3 = sor.u32 %s1064_s26, %s44_s29 }
  0x1c   : > { %p103_p8 = scmp.eq.s32.totalorder %s44_s29, 0  ;;  %p47_p9 = scmp.eq.s32.totalorder %s46_s3, 0 }
  0x1d   : > { %s505_s6 = sshll.u32 %s142_s30, 5  ;;  %s523_s7 = sshll.u32 %s953_s21, 3 }
  0x1e   : > { %s1084_s4 = scalar_select %p103_p8, %s913_s11, %s105_s28  }
  0x1f   : > { %s1087_s5 = scalar_select %p47_p9, %s937_s17, %s49_s25  }
  0x20   : > { %s152_s8 = sadd.s32 %s949_s20, %s523_s7  ;;  %s146_s2 = scalar_lea.vmem [#allocation3], %s505_s6 }
  0x21   : > { %s508_s23 = sshll.u32 %s152_s8, 7  ;;  %s155_s19 = sshll.u32 %s146_s2, 4  ;;  %s156_s19 = int_to_ptr.vmem [resolvable:$true] %s155_s19 }
  0x22   : > { %s1322_s0 = sld [smem:[#allocation17_spill]]  ;;  %p1098_p10 = pnand %p1309_p7, %p1068_p3 }
  0x23   : > { %p512_p11 = scmp.ge.s32.totalorder %s957_s22, 1  ;;  %s143_s25 = scalar_lea.sflag [#allocation4], %s142_s30 }
  0x24   : > { %p755_p12 = pneg %p1098_p10  ;;  %s766_s28 = scalar_lea.vmem %s156_s19, 512 }
  0x25   : > { %p767_p13 = scmp.ne.s32.totalorder %s156_s19, %s766_s28  ;;  %s959_s2 = smov [#allocation3]  }
  0x26   : > { %s771_s3 = sshll.u32 %s959_s2, 4  ;;  %s772_s3 = int_to_ptr.vmem [resolvable:$false] %s771_s3 }
  0x27   : > { %p769_p0 = pnand %p767_p13, %p755_p12  ;;  %s773_s1 = scalar_lea.vmem %s772_s3, 1024 }
  0x28   : > { %s154_s9 = scalar_lea.hbm %s1322_s0, %s508_s23  ;;  %p774_p4 = scmp.lt.s32.totalorder %s156_s19, %s772_s3 }
  0x29   : > { %p770_p1 = pneg %p769_p0  ;;  %p775_p8 = scmp.lt.s32.totalorder %s773_s1, %s766_s28 }
  0x2b   : > { %p776_p9 = por %p775_p8, %p774_p4 }
  0x2d   : > { %p777_p3 = pnand %p776_p9, %p770_p1 }
  0x2f   : > { %780 = shalt.err (!%p777_p3)
}
  0x30   : > { %s960_s18 = smov 256   ;;  %s1310_s23 = smov 128  }
  0x31   : > { %s1311_s27 = smov 8   ;;  %s1324_s30 = sld [smem:[#allocation12_spill]] }
  0x32   : > { %625 = dma.hbm_to_vmem [thread:$0]  (!%p1098_p10), %s154_s9, 512, %s156_s19, %s143_s25, %s960_s18, %s1310_s23, %s1311_s27  }
  0x33   : > { %p185_p12 = scmp.lt.s32.totalorder %s957_s22, 5  ;;  %s501_s7 = sadd.s32 4294967295, %s957_s22  }
  0x34   : > { %s502_s8 = sadd.s32 4294967294, %s957_s22   ;;  %p63_p0 = scmp.eq.s32.totalorder %s501_s7, 0 }
  0x35   : > { %p1112_p13 = pnand %p512_p11, %p185_p12  ;;  %s77_s28 = sadd.s32 1, %s925_s14 }
  0x36   : > { %s1122_s2 = scalar_select %p75_p6, %s925_s14, %s77_s28  }
  0x37   : > { %p1127_p1 = por %p63_p0, %p62_p5  ;;  %p84_p10 = scmp.ne.s32.totalorder %s925_s14, %s921_s13 }
  0x38   : > { %p90_p11 = scmp.ne.s32.totalorder %s921_s13, %s917_s12  ;;  %p115_p4 = scmp.ne.s32.totalorder %s913_s11, %s909_s10 }
  0x39   : > { %p86_p8 = por %p84_p10, %p57_p2  ;;  %p116_p9 = scmp.eq.s32.totalorder %s501_s7, 3 }
  0x3a   : > { %p1139_p3 = por %p90_p11, %p63_p0  ;;  %p121_p12 = scmp.ne.s32.totalorder %s909_s10, %s1324_s30 }
  0x3b   : > { %p1145_p7 = por %p116_p9, %p115_p4  ;;  %p122_p6 = scmp.eq.s32.totalorder %s502_s8, 3 }
  0x3c   : > { %s165_s15 = sand.u32 1, %s925_s14   ;;  %s524_s26 = sshll.u32 %s949_s20, 11 }
  0x3d   : > { %p1151_p5 = por %p122_p6, %p121_p12  ;;  %s509_s12 = sshll.u32 %s165_s15, 7 }
  0x3e   : > { %s1330_s18 = sld [smem:[#allocation18_spill]]  ;;  %p1331_p2 = scmp.lt.s32.totalorder %s957_s22, 4 }
  0x3f   : > { %s169_s30 = scalar_lea.vmem [#allocation6], %s509_s12  ;;  %s166_s8 = scalar_lea.sflag [#allocation7], %s165_s15 }
  0x40   : > { %p1160_p0 = pnand %p1331_p2, %p86_p8  ;;  %s177_s23 = sshll.u32 %s169_s30, 4  ;;  %s178_s23 = int_to_ptr.vmem [resolvable:$true] %s177_s23 }
  0x41   : > { %s794_s27 = scalar_lea.vmem %s178_s23, 2048  ;;  %s963_s0 = smov [#allocation6]  }
  0x42   : > { %p783_p10 = pneg %p1160_p0  ;;  %p795_p11 = scmp.ne.s32.totalorder %s178_s23, %s794_s27 }
  0x43   : > { %s799_s24 = sshll.u32 %s963_s0, 4  ;;  %s800_s24 = int_to_ptr.vmem [resolvable:$false] %s799_s24 }
  0x44   : > { %s176_s7 = scalar_lea.hbm %s1330_s18, %s524_s26  ;;  %p797_p4 = pnand %p795_p11, %p783_p10 }
  0x45   : > { %s801_s26 = scalar_lea.vmem %s800_s24, 4096  ;;  %p802_p12 = scmp.lt.s32.totalorder %s178_s23, %s800_s24 }
  0x46   : > { %p798_p9 = pneg %p797_p4  ;;  %p803_p8 = scmp.lt.s32.totalorder %s801_s26, %s794_s27 }
  0x48   : > { %p804_p6 = por %p803_p8, %p802_p12 }
  0x4a   : > { %p805_p2 = pnand %p804_p6, %p798_p9 }
  0x4c   : > { %808 = shalt.err (!%p805_p2)
}
  0x4d   : > { %s1333_s12 = smov 8   ;;  %s1334_s3 = smov 128  }
  0x4e   : > { %628 = dma.hbm_to_vmem [thread:$0]  (!%p1160_p0), %s176_s7, 2048, %s178_s23, %s166_s8, %s1334_s3, %s1334_s3, %s1333_s12  }
  0x4f   : > { %189 = sbr.rel (%p1112_p13) target bundleno = 370 (0x172), region = 28  ;;  %s191_s15 = sand.u32 (!%p1112_p13), 1, %s933_s16  }
  0x50   : > { %s513_s0 = sshll.u32 (!%p1112_p13), %s191_s15, 5  ;;  %s192_s1 = scalar_lea.sflag (!%p1112_p13), [#allocation4], %s191_s15 }
  0x51   : > { %s1174_s18 = scalar_lea.vmem (!%p1112_p13), [#allocation3], %s513_s0 }
  0x54   : > { %892 = dma.done.wait (%p1127_p1), %s192_s1, 512  }
  0x55   : > { %894 = vsyncadd (%p1127_p1), %s192_s1, 4294966784  ;;  %s200_s24 = sand.u32 1, %s921_s13  }
  0x56   : > { %s514_s27 = sshll.u32 %s200_s24, 7  ;;  %s201_s23 = scalar_lea.sflag [#allocation7], %s200_s24 }
  0x57   : > { %s1181_s7 = scalar_lea.vmem [#allocation6], %s514_s27 }
  0x58   : > { %896 = dma.done.wait (%p1139_p3), %s201_s23, 2048  }
  0x59   : > { %898 = vsyncadd (%p1139_p3), %s201_s23, 4294965248  ;;  %s227_s6 = sand.u32 1, %s909_s10   ;;  %s1335_s29 = sld [smem:[#allocation13_spill]] }
  0x5a   : > { %s515_s28 = sshll.u32 %s227_s6, 5 }
  0x5b   : > { %s1190_s30 = scalar_lea.vmem [#allocation8], %s515_s28 }
  0x5f   : > { %p516_p13 = scmp.ne.s32.totalorder %s1335_s29, 0 }
  0x61   : > { %236 = sbr.rel (%p516_p13) target bundleno = 105 (0x69), region = 40 }
  0x66   : > { %v964_v0 = vmov 0.0  }
  0x67   : > { %237 = vst [vmem:[#allocation2 + $0x10] sm:$0xff] %v964_v0  ;;  %238 = vst [vmem:[#allocation2] sm:$0xff] %v964_v0 }
  0x68   : > { %239 = vst [vmem:[#allocation2 + $0x18] sm:$0xff] %v964_v0  ;;  %240 = vst [vmem:[#allocation2 + $0x8] sm:$0xff] %v964_v0 }
  0x69 PF: > { %v264_v1 = vld [vmem:[%s1181_s7 + $0x78] sm:$0xff]  ;;  %v263_v2 = vld [vmem:[%s1181_s7 + $0x70] sm:$0xff]  ;;  %v262_v3 = vld [vmem:[%s1181_s7 + $0x68] sm:$0xff]  ;;  %s1336_s9 = sld [smem:[#allocation13_spill]] }
  0x6a   : > { %546 = vmatprep.subr.mxu0 %v264_v1  ;;  %584 = vmatprep.subr.mxu1 %v264_v1  ;;  %v261_v4 = vld [vmem:[%s1181_s7 + $0x60] sm:$0xff]  ;;  %v260_v5 = vld [vmem:[%s1181_s7 + $0x58] sm:$0xff]  ;;  %v259_v6 = vld [vmem:[%s1181_s7 + $0x50] sm:$0xff] }
  0x6b   : > { %547 = vmatpush3.msra.mxu0 %v264_v1  ;;  %600 = vmatpush3.msra.mxu1 %v264_v1  ;;  %v258_v7 = vld [vmem:[%s1181_s7 + $0x48] sm:$0xff]  ;;  %v257_v8 = vld [vmem:[%s1181_s7 + $0x40] sm:$0xff]  ;;  %v256_v9 = vld [vmem:[%s1181_s7 + $0x38] sm:$0xff] }
  0x6c   : > { %548 = vmatprep.subr.mxu0 %v263_v2  ;;  %585 = vmatprep.subr.mxu1 %v263_v2  ;;  %v255_v10 = vld [vmem:[%s1181_s7 + $0x30] sm:$0xff]  ;;  %v254_v11 = vld [vmem:[%s1181_s7 + $0x28] sm:$0xff]  ;;  %v253_v12 = vld [vmem:[%s1181_s7 + $0x20] sm:$0xff] }
  0x6d   : > { %549 = vmatpush3.msra.mxu0 %v263_v2  ;;  %601 = vmatpush3.msra.mxu1 %v263_v2  ;;  %v252_v13 = vld [vmem:[%s1181_s7 + $0x18] sm:$0xff]  ;;  %v251_v14 = vld [vmem:[%s1181_s7 + $0x10] sm:$0xff]  ;;  %v250_v15 = vld [vmem:[%s1181_s7 + $0x8] sm:$0xff] }
  0x6e   : > { %550 = vmatprep.subr.mxu0 %v262_v3  ;;  %586 = vmatprep.subr.mxu1 %v262_v3  ;;  %v249_v16 = vld [vmem:[%s1181_s7] sm:$0xff]  ;;  %v247_v18 = vld [vmem:[%s1174_s18 + $0x10] sm:$0xff]  ;;  %v246_v19 = vld [vmem:[%s1174_s18 + $0x8] sm:$0xff] }
  0x6f   : > { %551 = vmatpush3.msra.mxu0 %v262_v3  ;;  %602 = vmatpush3.msra.mxu1 %v262_v3  ;;  %v245_v17 = vld [vmem:[%s1174_s18] sm:$0xff]  ;;  %v248_v20 = vld [vmem:[%s1174_s18 + $0x18] sm:$0xff]  ;;  %v244_v22 = vld [vmem:[#allocation2 + $0x8] sm:$0xff]  ;;  %p517_p1 = scmp.ne.s32.totalorder %s1336_s9, 1 }
  0x70   : > { %552 = vmatprep.subr.mxu0 %v261_v4  ;;  %587 = vmatprep.subr.mxu1 %v261_v4  ;;  %v242_v21 = vld [vmem:[#allocation2] sm:$0xff]  ;;  %v241_v25 = vld [vmem:[#allocation2 + $0x10] sm:$0xff]  ;;  %v243_v26 = vld [vmem:[#allocation2 + $0x18] sm:$0xff] }
  0x71   : > { %553 = vmatpush3.msra.mxu0 %v261_v4  ;;  %603 = vmatpush3.msra.mxu1 %v261_v4 }
  0x72   : > { %554 = vmatprep.subr.mxu0 %v260_v5  ;;  %588 = vmatprep.subr.mxu1 %v260_v5 }
  0x73   : > { %555 = vmatpush3.msra.mxu0 %v260_v5  ;;  %604 = vmatpush3.msra.mxu1 %v260_v5 }
  0x74   : > { %556 = vmatprep.subr.mxu0 %v259_v6  ;;  %589 = vmatprep.subr.mxu1 %v259_v6 }
  0x75   : > { %557 = vmatpush3.msra.mxu0 %v259_v6  ;;  %605 = vmatpush3.msra.mxu1 %v259_v6 }
  0x76   : > { %558 = vmatprep.subr.mxu0 %v258_v7  ;;  %590 = vmatprep.subr.mxu1 %v258_v7 }
  0x77   : > { %559 = vmatpush3.msra.mxu0 %v258_v7  ;;  %606 = vmatpush3.msra.mxu1 %v258_v7 }
  0x78   : > { %560 = vmatprep.subr.mxu0 %v257_v8  ;;  %591 = vmatprep.subr.mxu1 %v257_v8 }
  0x79   : > { %561 = vmatpush3.msra.mxu0 %v257_v8  ;;  %607 = vmatpush3.msra.mxu1 %v257_v8 }
  0x7a   : > { %562 = vmatprep.subr.mxu0 %v256_v9  ;;  %592 = vmatprep.subr.mxu1 %v256_v9 }
  0x7b   : > { %563 = vmatpush3.msra.mxu0 %v256_v9  ;;  %608 = vmatpush3.msra.mxu1 %v256_v9 }
  0x7c   : > { %564 = vmatprep.subr.mxu0 %v255_v10  ;;  %593 = vmatprep.subr.mxu1 %v255_v10 }
  0x7d   : > { %565 = vmatpush3.msra.mxu0 %v255_v10  ;;  %609 = vmatpush3.msra.mxu1 %v255_v10 }
  0x7e   : > { %566 = vmatprep.subr.mxu0 %v254_v11  ;;  %594 = vmatprep.subr.mxu1 %v254_v11 }
  0x7f   : > { %567 = vmatpush3.msra.mxu0 %v254_v11  ;;  %610 = vmatpush3.msra.mxu1 %v254_v11 }
  0x80   : > { %568 = vmatprep.subr.mxu0 %v253_v12  ;;  %595 = vmatprep.subr.mxu1 %v253_v12 }
  0x81   : > { %569 = vmatpush3.msra.mxu0 %v253_v12  ;;  %611 = vmatpush3.msra.mxu1 %v253_v12 }
  0x82   : > { %570 = vmatprep.subr.mxu0 %v252_v13  ;;  %596 = vmatprep.subr.mxu1 %v252_v13 }
  0x83   : > { %571 = vmatpush3.msra.mxu0 %v252_v13  ;;  %612 = vmatpush3.msra.mxu1 %v252_v13 }
  0x84   : > { %572 = vmatprep.subr.mxu0 %v251_v14  ;;  %597 = vmatprep.subr.mxu1 %v251_v14 }
  0x85   : > { %573 = vmatpush3.msra.mxu0 %v251_v14  ;;  %613 = vmatpush3.msra.mxu1 %v251_v14 }
  0x86   : > { %574 = vmatprep.subr.mxu0 %v250_v15  ;;  %598 = vmatprep.subr.mxu1 %v250_v15 }
  0x87   : > { %575 = vmatpush3.msra.mxu0 %v250_v15  ;;  %614 = vmatpush3.msra.mxu1 %v250_v15 }
  0x88   : > { %576 = vmatprep.subr.mxu0 %v249_v16  ;;  %599 = vmatprep.subr.mxu1 %v249_v16 }
  0x89   : > { %577 = vmatpush3.msra.mxu0 %v249_v16  ;;  %615 = vmatpush3.msra.mxu1 %v249_v16 }
  0x8a   : > { %578 = vmatprep.mubr.f32.mxu0 %v245_v17  ;;  %581 = vmatprep.mubr.f32.mxu1 %v247_v18 }
  0x8b   : > { %579 = vmatmul.mubr.f32.vlgmr.msra.gmra.mxu0 %v246_v19  ;;  %582 = vmatmul.mubr.f32.vlgmr.msra.gmra.mxu1 %v248_v20 }
 0x14b   : > { %v580_v23 = vpop.f32.mrf.mxu0  ;;  %v583_v24 = vpop.f32.mrf.mxu1 }
 0x14c   : > { %v351_v27 = vadd.f32 %v580_v23, %v242_v21  ;;  %v353_v28 = vadd.f32 %v583_v24, %v244_v22  ;;  %361 = sbr.rel (%p517_p1) target bundleno = 345 (0x159), region = 44 }
 0x14d   : > { %v331_v29 = vpop.f32.mrf.mxu0  ;;  %v341_v30 = vpop.f32.mrf.mxu1 }
 0x14e   : > { %355 = vst [vmem:[#allocation2] sm:$0xff] %v351_v27  ;;  %357 = vst [vmem:[#allocation2 + $0x8] sm:$0xff] %v353_v28  ;;  %v350_v31 = vadd.f32 %v331_v29, %v241_v25  ;;  %v352_v32 = vadd.f32 %v341_v30, %v243_v26 }
 0x150   : > { %354 = vst [vmem:[#allocation2 + $0x10] sm:$0xff] %v350_v31  ;;  %356 = vst [vmem:[#allocation2 + $0x18] sm:$0xff] %v352_v32 }
 0x155   : > { %v363_v34 = vld [vmem:[#allocation2] sm:$0xff]  ;;  %v365_v36 = vld [vmem:[#allocation2 + $0x8] sm:$0xff] }
 0x156   : > { %367 = vst [vmem:[%s1190_s30 + $0x8] sm:$0xff] %v363_v34  ;;  %369 = vst [vmem:[%s1190_s30 + $0x18] sm:$0xff] %v365_v36 }
 0x157   : > { %v362_v33 = vld [vmem:[#allocation2 + $0x10] sm:$0xff]  ;;  %v364_v35 = vld [vmem:[#allocation2 + $0x18] sm:$0xff] }
 0x158   : > { %366 = vst [vmem:[%s1190_s30] sm:$0xff] %v362_v33  ;;  %368 = vst [vmem:[%s1190_s30 + $0x10] sm:$0xff] %v364_v35 }
 0x159 PF: > { %s1337_s8 = sld [smem:[#allocation14_spill]]  ;;  %s385_s18 = sshll.u32 %s1190_s30, 4  ;;  %s1225_s18 = int_to_ptr.vmem [resolvable:$true] %s385_s18 }
 0x15a   : > { %s1338_s15 = sld [smem:[#allocation19_spill]]  ;;  %s1229_s24 = scalar_lea.sflag [#allocation5], %s227_s6 }
 0x15b   : > { %s809_s27 = scalar_lea.vmem %s1225_s18, 512  ;;  %s965_s23 = smov [#allocation8]  }
 0x15c   : > { %p810_p3 = scmp.ne.s32.totalorder %s1225_s18, %s809_s27  ;;  %s813_s7 = sshll.u32 %s965_s23, 4  ;;  %s814_s7 = int_to_ptr.vmem [resolvable:$false] %s813_s7 }
 0x15d   : > { %s815_s28 = scalar_lea.vmem %s814_s7, 1024  ;;  %p816_p11 = scmp.lt.s32.totalorder %s1225_s18, %s814_s7 }
 0x15e   : > { %p811_p0 = pnand %p810_p3, %p1145_p7  ;;  %p817_p4 = scmp.lt.s32.totalorder %s815_s28, %s809_s27 }
 0x15f   : > { %s525_s26 = sshll.u32 %s1337_s8, 9 }
 0x160   : > { %s1339_s0 = smov %s1338_s15  ;;  %s1222_s1 = scalar_lea.hbm %s1338_s15, %s525_s26 }
 0x161   : > { %p812_p10 = pneg %p811_p0  ;;  %p818_p9 = por %p817_p4, %p816_p11 }
 0x163   : > { %p819_p12 = pnand %p818_p9, %p812_p10 }
 0x165   : > { %822 = shalt.err (!%p819_p12)
}
 0x166   : > { %s823_s6 = scalar_lea.hbm %s1222_s1, 512  ;;  %s827_s9 = scalar_lea.hbm %s1339_s0, 1024 }
 0x167   : > { %p824_p8 = scmp.ne.s32.totalorder %s1222_s1, %s823_s6  ;;  %p828_p13 = scmp.lt.s32.totalorder %s1222_s1, %s1339_s0 }
 0x168   : > { %p829_p1 = scmp.lt.s32.totalorder %s827_s9, %s823_s6 }
 0x169   : > { %p825_p6 = pnand %p824_p8, %p1145_p7 }
 0x16a   : > { %p830_p3 = por %p829_p1, %p828_p13 }
 0x16b   : > { %p826_p2 = pneg %p825_p6 }
 0x16d   : > { %p831_p0 = pnand %p830_p3, %p826_p2 }
 0x16f   : > { %834 = shalt.err (!%p831_p0)
}
 0x170   : > { %s966_s12 = smov 128   ;;  %s967_s3 = smov 8  }
 0x171   : > { %620 = dma.vmem_to_hbm [thread:$0]  (%p1145_p7), %s1225_s18, 512, %s1222_s1, %s1229_s24, %s966_s12, %s966_s12, %s967_s3  }
 0x172 PF: > { %s1340_s15 = sld [smem:[#allocation12_spill]]  ;;  %p634_p10 = scmp.ge.s32.totalorder %s957_s22, 2 }
 0x174   : > { %p630_p11 = pnand %p634_p10, %p1151_p5 }
 0x176   : > { %p631_p4 = pneg %p630_p11 }
 0x178   : > { %s400_s27 = sand.u32 1, %s1340_s15  }
 0x179   : > { %s401_s23 = scalar_lea.sflag [#allocation5], %s400_s27 }
 0x17a   : > { %900 = dma.done.wait (%p631_p4), %s401_s23, 512  }
 0x17b   : > { %902 = vsyncadd (%p631_p4), %s401_s23, 4294966784  ;;  %s21_s22 = sadd.s32 1, %s957_s22   ;;  %s1342_s25 = sld [smem:[#allocation15_spill]] }
 0x17c   : > { %p1257_p9 = scmp.ge.s32.totalorder %s21_s22, 6   ;;  %s1343_s1 = sld [smem:[#allocation16_spill]] }
 0x17d   : > { %s1344_s9 = smov %s909_s10  ;;  %s1345_s10 = smov %s913_s11 }
 0x17e   : > { %s1346_s11 = smov %s1084_s4  ;;  %s1347_s12 = smov %s921_s13 }
 0x17f   : > { %s1348_s13 = smov %s925_s14  ;;  %s1349_s14 = smov %s1122_s2 }
 0x180   : > { %s1350_s15 = smov %s933_s16  ;;  %s1351_s16 = smov %s937_s17 }
 0x181   : > { %s1352_s17 = smov %s1087_s5  ;;  %s1353_s18 = smov %s949_s20 }
 0x182   : > { %s1354_s19 = smov %s953_s21  ;;  %s1355_s20 = smov %s1342_s25 }
 0x183   : > { %s1356_s21 = smov %s1343_s1  ;;  %20 = sbr.rel (!%p1257_p9) target bundleno = 16 (0x10), region = 94 }
 0x188   :  { %406 = vsyncpa [#allocation4], 1 }
 0x189   :  { %408 = vsyncpa [#allocation4 + $0x1], 1 }
 0x18a   :  { %409 = vsyncpa [#allocation7], 1 }
 0x18b   :  { %411 = vsyncpa [#allocation7 + $0x1], 1 }
 0x18c   :  { %412 = vsyncpa [#allocation5], 1 }
 0x18d   :  { %414 = vsyncpa [#allocation5 + $0x1], 1 }

</bundles_post_ra>
